<compile_context>
chip_gen: v5e
topology: v5e:2x2
jax: 0.10.0
libtpu: 0.0.40
codegen_flags: <defaults>
</compile_context>

<pallas_src>
import functools

import jax
import jax.numpy as jnp
from jax.experimental import pallas as pl
from jax.experimental.pallas import tpu as pltpu

HIDDEN = 50
MAX_K = 2
_MAX_TB = 2048   # lane-tile cap; (50, 2048) f32 activations ~400 KiB, far under VMEM


def _round_up(a, m):
    return ((a + m - 1) // m) * m


def _device_kind():
    try:
        return jax.devices()[0].device_kind.lower()
    except Exception:
        return ""


def _num_tensorcores_per_chip():
    # v7x has 2 TensorCores per chip (a "parallel" grid axis is sharded across
    # them); v5e/v6e have 1, so splitting the batch there is pure overhead.
    return 2 if "v7" in _device_kind() else 1


def _use_bf16_tanh():
    # v6e/v7x have bf16-capable VPU/EUP: bf16 tanh halves EUP vreg pushes and
    # removes the separate post-tanh bf16 cast.  v5e (and older) keep f32 tanh.
    kind = _device_kind()
    return ("v6" in kind) or ("v7" in kind)


def committor_kernel(xT_ref, w1_ref, b1_ref, w2_ref, b2_ref, w3_ref, b3_ref,
                     w4_ref, b4_ref, o_ref, *, dim, bf16_tanh):
    # Fully fused 4-layer MLP per batch tile, computed feature-major
    # (features on sublanes, batch on lanes); activations never leave VMEM.
    xT = xT_ref[...].astype(jnp.float32)                       # (dim, tb)

    def act(pre):                                              # tanh + bf16 for next MXU pass
        if bf16_tanh:
            return jnp.tanh(pre.astype(jnp.bfloat16))
        return jnp.tanh(pre).astype(jnp.bfloat16)

    # ---- layer 1: dim -> 50 --------------------------------------------------
    if dim <= 8:
        # Tiny contraction dim (dim=2 for the 2D problem): broadcast FMAs on
        # the VPU over lane-dense (50, tb) tiles; frees the MXU/result-FIFO.
        w1 = w1_ref[...]                                       # (H, dim) f32
        pre = b1_ref[...]                                      # (H, 1), broadcasts
        for d in range(dim):                                   # static unroll
            pre = pre + w1[:, d:d + 1] * xT[d:d + 1, :]
    else:
        pre = jnp.dot(w1_ref[...], xT,
                      preferred_element_type=jnp.float32) + b1_ref[...]
    h = act(pre)                                               # (H, tb) bf16

    # ---- layers 2/3: 50 -> 50 (bf16 MXU operands, f32 accumulation) ----------
    h = act(jnp.dot(w2_ref[...], h,
                    preferred_element_type=jnp.float32) + b2_ref[...])
    h = act(jnp.dot(w3_ref[...], h,
                    preferred_element_type=jnp.float32) + b3_ref[...])

    # ---- layer 4: 50 -> K, emitted (K, tb): lane-dense output stores ---------
    out = jnp.dot(w4_ref[...], h,
                  preferred_element_type=jnp.float32) + b4_ref[...]
    o_ref[...] = out.astype(o_ref.dtype)


def prepare_kernel_params(params):
    """Build kernel-side parameter layouts once (cache & reuse across calls).

    Weights are PyTorch-native (out_features, in_features); biases become
    (out_features, 1) columns so they broadcast over the lane (batch) axis.
    Hidden/output weights are bf16 (MXU-native); layer 1 stays f32 (VPU path).
    """
    return dict(
        w1=params["W1"].astype(jnp.float32),                   # (H, dim)
        b1=params["b1"].reshape(-1, 1).astype(jnp.float32),
        w2=params["W2"].astype(jnp.bfloat16),                  # (H, H)
        b2=params["b2"].reshape(-1, 1).astype(jnp.float32),
        w3=params["W3"].astype(jnp.bfloat16),                  # (H, H)
        b3=params["b3"].reshape(-1, 1).astype(jnp.float32),
        w4=params["W4"].astype(jnp.bfloat16),                  # (K, H)
        b4=params["b4"].reshape(-1, 1).astype(jnp.float32),
    )


def committor_net(x, kparams, *, max_tb=_MAX_TB):
    """x: (B, dim) f32; kparams: output of prepare_kernel_params().
    Returns (B, K) f32, matching CommittorNet.forward."""
    B, dim = x.shape
    H = kparams["w1"].shape[0]
    K = kparams["w4"].shape[0]

    # ---- batch tile selection (generation-aware) -----------------------------
    # Batch lives on the lane axis, so tiles are multiples of 128 (lane-dense
    # stores).  Single-TC chips (v5e/v6e) get one big tile; v7x gets an even
    # number of tiles (>=2) so both TensorCores are fed via the parallel axis.
    if B <= 128:
        tb = 128
    else:
        ncores = _num_tensorcores_per_chip()
        if ncores >= 2:
            n_tiles = max(ncores, ncores * pl.cdiv(B, ncores * max_tb))
            tb = _round_up(pl.cdiv(B, n_tiles), 128)
        else:
            tb = min(max_tb, _round_up(B, 128))
    grid_b = pl.cdiv(B, tb)
    Bp = grid_b * tb
    # NOTE: if max_tb is ever swept far beyond 2048, set
    # pltpu.CompilerParams(vmem_limit_bytes=...) explicitly (v7x: 64 MiB phys).

    # Feature-major input: (dim, Bp), batch on the lane axis.  Padded columns
    # produce garbage through the biases/tanh and are sliced off at the end.
    xT = jnp.pad(x, ((0, Bp - B), (0, 0))).T

    def const_spec(shape):
        # Small weight/bias arrays: one full-array block, constant index map,
        # resident in VMEM across all grid steps.
        return pl.BlockSpec(shape, lambda i, _n=len(shape): (0,) * _n)

    in_specs = [
        pl.BlockSpec((dim, tb), lambda i: (0, i)),
        const_spec(kparams["w1"].shape), const_spec(kparams["b1"].shape),
        const_spec(kparams["w2"].shape), const_spec(kparams["b2"].shape),
        const_spec(kparams["w3"].shape), const_spec(kparams["b3"].shape),
        const_spec(kparams["w4"].shape), const_spec(kparams["b4"].shape),
    ]
    out_spec = pl.BlockSpec((K, tb), lambda i: (0, i))

    kernel = functools.partial(committor_kernel, dim=dim,
                               bf16_tanh=_use_bf16_tanh())

    param_bytes = sum(int(v.size) * v.dtype.itemsize for v in kparams.values())
    cost = pl.CostEstimate(
        flops=2 * Bp * (dim * H + 2 * H * H + H * K),
        transcendentals=3 * Bp * H,
        bytes_accessed=Bp * dim * 4 + Bp * K * 4 + param_bytes,
    )

    out_t = pl.pallas_call(
        kernel,
        out_shape=jax.ShapeDtypeStruct((K, Bp), jnp.float32),
        grid_spec=pltpu.PrefetchScalarGridSpec(
            num_scalar_prefetch=0,
            grid=(grid_b,),
            in_specs=in_specs,
            out_specs=out_spec,
        ),
        compiler_params=pltpu.CompilerParams(
            dimension_semantics=("parallel",),
        ),
        cost_estimate=cost,
    )(xT, kparams["w1"], kparams["b1"], kparams["w2"], kparams["b2"],
      kparams["w3"], kparams["b3"], kparams["w4"], kparams["b4"])

    return out_t[:, :B].T                                      # slice, then transpose


def init_params(key, dim, K=MAX_K):
    """torch.nn.Linear-style init: W (out_features, in_features), b (out,),
    U(-1/sqrt(fan_in), 1/sqrt(fan_in)).  Master copies stay f32; the kernel
    layouts (bf16 etc.) are derived once via prepare_kernel_params."""
    sizes = [(HIDDEN, dim), (HIDDEN, HIDDEN), (HIDDEN, HIDDEN), (K, HIDDEN)]
    params = {}
    keys = jax.random.split(key, 2 * len(sizes))
    for idx, (fan_out, fan_in) in enumerate(sizes):
        bound = 1.0 / jnp.sqrt(jnp.float32(fan_in))
        params[f"W{idx + 1}"] = jax.random.uniform(
            keys[2 * idx], (fan_out, fan_in), jnp.float32, -bound, bound)
        params[f"b{idx + 1}"] = jax.random.uniform(
            keys[2 * idx + 1], (fan_out,), jnp.float32, -bound, bound)
    return params


def committor_ref(x, params):
    h = jnp.tanh(x @ params["W1"].T + params["b1"])
    h = jnp.tanh(h @ params["W2"].T + params["b2"])
    h = jnp.tanh(h @ params["W3"].T + params["b3"])
    return h @ params["W4"].T + params["b4"]


if __name__ == "__main__":
    key = jax.random.PRNGKey(0)
    dim = 2            # 2D committor problem
    B = 300            # not a tile multiple: exercises padding (2 tiles on v7x)

    kp, kx = jax.random.split(key)
    params = init_params(kp, dim)
    kparams = prepare_kernel_params(params)   # build once, reuse every MD step
    x = jax.random.normal(kx, (B, dim), jnp.float32)

    out = jax.block_until_ready(committor_net(x, kparams))
    ref = committor_ref(x, params)

    assert out.shape == (B, MAX_K), out.shape
    # Hidden matmuls (and tanh on v6e/v7x) use bf16 operands with f32
    # accumulation, so compare against the pure-f32 reference with a
    # correspondingly loosened tolerance.
    err = float(jnp.max(jnp.abs(out - ref)))
    assert jnp.allclose(out, ref, atol=3e-2, rtol=3e-2), err

    print("KERNEL_OK")
</pallas_src>

<mosaic_0001>
module attributes {stable_mosaic.version = 11 : i64} {
  func.func @committor_kernel(%arg0: i32, %arg1: memref<2x384xf32, #tpu.memory_space<vmem>>, %arg2: memref<50x2xf32, #tpu.memory_space<vmem>>, %arg3: memref<50x1xf32, #tpu.memory_space<vmem>>, %arg4: memref<50x50xbf16, #tpu.memory_space<vmem>>, %arg5: memref<50x1xf32, #tpu.memory_space<vmem>>, %arg6: memref<50x50xbf16, #tpu.memory_space<vmem>>, %arg7: memref<50x1xf32, #tpu.memory_space<vmem>>, %arg8: memref<2x50xbf16, #tpu.memory_space<vmem>>, %arg9: memref<2x1xf32, #tpu.memory_space<vmem>>, %arg10: memref<2x384xf32, #tpu.memory_space<vmem>>) attributes {dimension_semantics = [#tpu.dimension_semantics<parallel>], iteration_bounds = array<i64: 1>, scalar_prefetch = 0 : i64, scratch_operands = 0 : i64, tpu.core_type = #tpu.core_type<tc>, window_params = [{transform_indices = @transform_0, window_bounds = array<i64: 2, 384>}, {pipeline_mode = #tpu.pipeline_mode<synchronous>, transform_indices = @transform_1, window_bounds = array<i64: 50, 2>}, {pipeline_mode = #tpu.pipeline_mode<synchronous>, transform_indices = @transform_2, window_bounds = array<i64: 50, 1>}, {pipeline_mode = #tpu.pipeline_mode<synchronous>, transform_indices = @transform_3, window_bounds = array<i64: 50, 50>}, {pipeline_mode = #tpu.pipeline_mode<synchronous>, transform_indices = @transform_4, window_bounds = array<i64: 50, 1>}, {pipeline_mode = #tpu.pipeline_mode<synchronous>, transform_indices = @transform_5, window_bounds = array<i64: 50, 50>}, {pipeline_mode = #tpu.pipeline_mode<synchronous>, transform_indices = @transform_6, window_bounds = array<i64: 50, 1>}, {pipeline_mode = #tpu.pipeline_mode<synchronous>, transform_indices = @transform_7, window_bounds = array<i64: 2, 50>}, {pipeline_mode = #tpu.pipeline_mode<synchronous>, transform_indices = @transform_8, window_bounds = array<i64: 2, 1>}, {transform_indices = @transform_9, window_bounds = array<i64: 2, 384>}]} {
    %c0 = arith.constant 0 : index
    %c0_0 = arith.constant 0 : index
    %0 = vector.load %arg1[%c0, %c0_0] : memref<2x384xf32, #tpu.memory_space<vmem>>, vector<2x384xf32>
    %c0_1 = arith.constant 0 : index
    %c0_2 = arith.constant 0 : index
    %1 = vector.load %arg2[%c0_1, %c0_2] : memref<50x2xf32, #tpu.memory_space<vmem>>, vector<50x2xf32>
    %c0_3 = arith.constant 0 : index
    %c0_4 = arith.constant 0 : index
    %2 = vector.load %arg3[%c0_3, %c0_4] : memref<50x1xf32, #tpu.memory_space<vmem>>, vector<50x1xf32>
    %3 = vector.extract_strided_slice %1 {offsets = [0, 0], sizes = [50, 1], strides = [1, 1]} : vector<50x2xf32> to vector<50x1xf32>
    %4 = vector.extract_strided_slice %0 {offsets = [0, 0], sizes = [1, 384], strides = [1, 1]} : vector<2x384xf32> to vector<1x384xf32>
    %5 = vector.broadcast %3 : vector<50x1xf32> to vector<50x384xf32>
    %6 = vector.broadcast %4 : vector<1x384xf32> to vector<50x384xf32>
    %7 = arith.mulf %5, %6 : vector<50x384xf32>
    %8 = vector.broadcast %2 : vector<50x1xf32> to vector<50x384xf32>
    %9 = arith.addf %8, %7 : vector<50x384xf32>
    %10 = vector.extract_strided_slice %1 {offsets = [0, 1], sizes = [50, 1], strides = [1, 1]} : vector<50x2xf32> to vector<50x1xf32>
    %11 = vector.extract_strided_slice %0 {offsets = [1, 0], sizes = [1, 384], strides = [1, 1]} : vector<2x384xf32> to vector<1x384xf32>
    %12 = vector.broadcast %10 : vector<50x1xf32> to vector<50x384xf32>
    %13 = vector.broadcast %11 : vector<1x384xf32> to vector<50x384xf32>
    %14 = arith.mulf %12, %13 : vector<50x384xf32>
    %15 = arith.addf %9, %14 : vector<50x384xf32>
    %16 = math.tanh %15 : vector<50x384xf32>
    %17 = arith.truncf %16 : vector<50x384xf32> to vector<50x384xbf16>
    %c0_5 = arith.constant 0 : index
    %c0_6 = arith.constant 0 : index
    %18 = vector.load %arg4[%c0_5, %c0_6] : memref<50x50xbf16, #tpu.memory_space<vmem>>, vector<50x50xbf16>
    %cst = arith.constant dense<0.000000e+00> : vector<50x384xf32>
    %19 = tpu.matmul %18, %17, %cst {dimension_numbers = #tpu.dot_dimension_numbers<[1], [0], [0], [1], [0, 0, 1, 1], [], []>} : vector<50x50xbf16>, vector<50x384xbf16>, vector<50x384xf32> -> vector<50x384xf32>
    %c0_7 = arith.constant 0 : index
    %c0_8 = arith.constant 0 : index
    %20 = vector.load %arg5[%c0_7, %c0_8] : memref<50x1xf32, #tpu.memory_space<vmem>>, vector<50x1xf32>
    %21 = vector.broadcast %20 : vector<50x1xf32> to vector<50x384xf32>
    %22 = arith.addf %19, %21 : vector<50x384xf32>
    %23 = math.tanh %22 : vector<50x384xf32>
    %24 = arith.truncf %23 : vector<50x384xf32> to vector<50x384xbf16>
    %c0_9 = arith.constant 0 : index
    %c0_10 = arith.constant 0 : index
    %25 = vector.load %arg6[%c0_9, %c0_10] : memref<50x50xbf16, #tpu.memory_space<vmem>>, vector<50x50xbf16>
    %cst_11 = arith.constant dense<0.000000e+00> : vector<50x384xf32>
    %26 = tpu.matmul %25, %24, %cst_11 {dimension_numbers = #tpu.dot_dimension_numbers<[1], [0], [0], [1], [0, 0, 1, 1], [], []>} : vector<50x50xbf16>, vector<50x384xbf16>, vector<50x384xf32> -> vector<50x384xf32>
    %c0_12 = arith.constant 0 : index
    %c0_13 = arith.constant 0 : index
    %27 = vector.load %arg7[%c0_12, %c0_13] : memref<50x1xf32, #tpu.memory_space<vmem>>, vector<50x1xf32>
    %28 = vector.broadcast %27 : vector<50x1xf32> to vector<50x384xf32>
    %29 = arith.addf %26, %28 : vector<50x384xf32>
    %30 = math.tanh %29 : vector<50x384xf32>
    %31 = arith.truncf %30 : vector<50x384xf32> to vector<50x384xbf16>
    %c0_14 = arith.constant 0 : index
    %c0_15 = arith.constant 0 : index
    %32 = vector.load %arg8[%c0_14, %c0_15] : memref<2x50xbf16, #tpu.memory_space<vmem>>, vector<2x50xbf16>
    %cst_16 = arith.constant dense<0.000000e+00> : vector<2x384xf32>
    %33 = tpu.matmul %32, %31, %cst_16 {dimension_numbers = #tpu.dot_dimension_numbers<[1], [0], [0], [1], [0, 0, 1, 1], [], []>} : vector<2x50xbf16>, vector<50x384xbf16>, vector<2x384xf32> -> vector<2x384xf32>
    %c0_17 = arith.constant 0 : index
    %c0_18 = arith.constant 0 : index
    %34 = vector.load %arg9[%c0_17, %c0_18] : memref<2x1xf32, #tpu.memory_space<vmem>>, vector<2x1xf32>
    %35 = vector.broadcast %34 : vector<2x1xf32> to vector<2x384xf32>
    %36 = arith.addf %33, %35 : vector<2x384xf32>
    %c0_19 = arith.constant 0 : index
    %c0_20 = arith.constant 0 : index
    %37 = vector.load %arg10[%c0_19, %c0_20] : memref<2x384xf32, #tpu.memory_space<vmem>>, vector<2x384xf32>
    tpu.vector_store %arg10[%c0_19, %c0_20], %36 {strides = array<i32>} : memref<2x384xf32, #tpu.memory_space<vmem>>, vector<2x384xf32>,
    return
  }
  func.func @transform_0(%arg0: i32) -> (i32, i32) {
    %c0_i32 = arith.constant 0 : i32
    %c0_i32_0 = arith.constant 0 : i32
    return %c0_i32, %arg0 : i32, i32
  }
  func.func @transform_1(%arg0: i32) -> (i32, i32) {
    %c0_i32 = arith.constant 0 : i32
    %c0_i32_0 = arith.constant 0 : i32
    %c0_i32_1 = arith.constant 0 : i32
    return %c0_i32, %c0_i32_0 : i32, i32
  }
  func.func @transform_2(%arg0: i32) -> (i32, i32) {
    %c0_i32 = arith.constant 0 : i32
    %c0_i32_0 = arith.constant 0 : i32
    %c0_i32_1 = arith.constant 0 : i32
    return %c0_i32, %c0_i32_0 : i32, i32
  }
  func.func @transform_3(%arg0: i32) -> (i32, i32) {
    %c0_i32 = arith.constant 0 : i32
    %c0_i32_0 = arith.constant 0 : i32
    %c0_i32_1 = arith.constant 0 : i32
    return %c0_i32, %c0_i32_0 : i32, i32
  }
  func.func @transform_4(%arg0: i32) -> (i32, i32) {
    %c0_i32 = arith.constant 0 : i32
    %c0_i32_0 = arith.constant 0 : i32
    %c0_i32_1 = arith.constant 0 : i32
    return %c0_i32, %c0_i32_0 : i32, i32
  }
  func.func @transform_5(%arg0: i32) -> (i32, i32) {
    %c0_i32 = arith.constant 0 : i32
    %c0_i32_0 = arith.constant 0 : i32
    %c0_i32_1 = arith.constant 0 : i32
    return %c0_i32, %c0_i32_0 : i32, i32
  }
  func.func @transform_6(%arg0: i32) -> (i32, i32) {
    %c0_i32 = arith.constant 0 : i32
    %c0_i32_0 = arith.constant 0 : i32
    %c0_i32_1 = arith.constant 0 : i32
    return %c0_i32, %c0_i32_0 : i32, i32
  }
  func.func @transform_7(%arg0: i32) -> (i32, i32) {
    %c0_i32 = arith.constant 0 : i32
    %c0_i32_0 = arith.constant 0 : i32
    %c0_i32_1 = arith.constant 0 : i32
    return %c0_i32, %c0_i32_0 : i32, i32
  }
  func.func @transform_8(%arg0: i32) -> (i32, i32) {
    %c0_i32 = arith.constant 0 : i32
    %c0_i32_0 = arith.constant 0 : i32
    %c0_i32_1 = arith.constant 0 : i32
    return %c0_i32, %c0_i32_0 : i32, i32
  }
  func.func @transform_9(%arg0: i32) -> (i32, i32) {
    %c0_i32 = arith.constant 0 : i32
    %c0_i32_0 = arith.constant 0 : i32
    return %c0_i32, %arg0 : i32, i32
  }
}

</mosaic_0001>

<bundles_post_ra>
// kernel: tpu_custom_call.1
= control target key start
LH: loop header
LB: loop body
LE: loop exit
PB: predicated region body
PF: predicated region fallthrough
CT: control target
= control target key end

     0   :  { %v1016_v1 = vmov 1   ;;  %v1017_v2 = vmov 0   ;;  %s1457_s0 = inlined_call_operand.vmem [shape: f32[2,384], index: 0, kind: input, shape index: {}]   ;;  %s1458_s1 = inlined_call_operand.vmem [shape: f32[50,2], index: 1, kind: input, shape index: {}]   ;;  %s1459_s2 = inlined_call_operand.vmem [shape: f32[50,1], index: 2, kind: input, shape index: {}]   ;;  %s1460_s3 = inlined_call_operand.vmem [shape: bf16[50,50], index: 3, kind: input, shape index: {}]   ;;  %s1461_s4 = inlined_call_operand.vmem [shape: f32[50,1], index: 4, kind: input, shape index: {}]   ;;  %s1462_s5 = inlined_call_operand.vmem [shape: bf16[50,50], index: 5, kind: input, shape index: {}]   ;;  %s1463_s6 = inlined_call_operand.vmem [shape: f32[50,1], index: 6, kind: input, shape index: {}]   ;;  %s1464_s7 = inlined_call_operand.vmem [shape: bf16[2,50], index: 7, kind: input, shape index: {}]   ;;  %s1465_s8 = inlined_call_operand.vmem [shape: f32[2,1], index: 8, kind: input, shape index: {}]   ;;  %s1466_s9 = inlined_call_operand.hbm [shape: f32[2,384], index: 9, kind: output, shape index: {}]  }
   0x1   :  { %v41_v0 = vld [vmem:[%s1458_s1 + $0x30] sm:$0x3]  ;;  %849 = vset.pattern.permute.xlu1 %v1016_v1  ;;  %848 = vset.pattern.permute.xlu0 %v1017_v2  ;;  %v40_v3 = vld [vmem:[%s1458_s1 + $0x28] sm:$0xff] }
   0x2   :  { %196 = vperm.xlu1 %849, %v41_v0   ;;  %81 = vperm.xlu0 %848, %v41_v0  }
   0x3   :  { %851 = vset.pattern.permute.xlu2 %v1017_v2 }
   0x4   :  { %14 = vsyncpa [#allocation3], 0  ;;  %76 = vperm.xlu2 %851, %v40_v3   ;;  %v48_v4 = vld [vmem:[%s1459_s2 + $0x30] sm:$0x3]  ;;  %v39_v5 = vld [vmem:[%s1458_s1 + $0x20] sm:$0xff]  ;;  %vm363_vm0 = vcmask 1040384  }
   0x5   :  { %v46_v6 = vld [vmem:[%s1459_s2 + $0x20] sm:$0xff]  ;;  %v47_v7 = vld [vmem:[%s1459_s2 + $0x28] sm:$0xff]  ;;  %v37_v8 = vld [vmem:[%s1458_s1 + $0x10] sm:$0xff]  ;;  %vm350_vm1 = vcmask 408576   ;;  %vm758_vm2 = vcmask 1041408   ;;  %s771_s16 = sshll.u32 %s1466_s9, 4  ;;  %s772_s16 = int_to_ptr.hbm [resolvable:$true] %s771_s16 }
   0x6   :  { %v38_v9 = vld [vmem:[%s1458_s1 + $0x18] sm:$0xff]  ;;  %v44_v10 = vld [vmem:[%s1459_s2 + $0x10] sm:$0xff]  ;;  %v35_v12 = vld [vmem:[%s1458_s1] sm:$0xff]  ;;  %vm760_vm3 = vcmask 1043456  }
   0x7   :  { %v45_v11 = vld [vmem:[%s1459_s2 + $0x18] sm:$0xff]  ;;  %v36_v13 = vld [vmem:[%s1458_s1 + $0x8] sm:$0xff]  ;;  %v42_v14 = vld [vmem:[%s1459_s2] sm:$0xff] }
   0x8   :  { %v43_v15 = vld [vmem:[%s1459_s2 + $0x8] sm:$0xff]  ;;  %v296_v16 = vld [vmem:[%s1461_s4 + $0x30] sm:$0x3]  ;;  %v497_v20 = vld [vmem:[%s1463_s6] sm:$0xff] }
   0x9   :  { %v292_v17 = vld [vmem:[%s1461_s4 + $0x10] sm:$0xff]  ;;  %v291_v18 = vld [vmem:[%s1461_s4 + $0x8] sm:$0xff]  ;;  %v1131_v22 = vld [vmem:[%s1457_s0] sm:$0x3f] }
   0xa   :  { %850 = vset.pattern.permute.xlu1 %v1017_v2  ;;  %147 = vperm.xlu0 %848, %v48_v4   ;;  %v502_v19 = vld [vmem:[%s1463_s6 + $0x28] sm:$0xff]  ;;  %v85_v24 = vperm.slane %v1131_v22, 0  ;;  %v86_v25 = vperm.slane %v1131_v22, 2  ;;  %v199_v28 = vperm.slane %v1131_v22, 1  ;;  %v200_v29 = vperm.slane %v1131_v22, 3 }
   0xb   :  { %71 = vperm.xlu1 %850, %v39_v5  }
   0xc   :  { %137 = vperm.xlu2 %851, %v46_v6   ;;  %v1143_v30 = vperm.slane %v85_v24, 0  ;;  %v1145_v31 = vperm.slane %v86_v25, 0  ;;  %v1147_v32 = vperm.slane %v199_v28, 1  ;;  %v1149_v33 = vperm.slane %v200_v29, 1 }
  0x12   :  { %142 = vperm.xlu0 %848, %v47_v7  }
  0x13   :  { %852 = vset.pattern.permute.xlu1 %v1016_v1 }
  0x14   :  { %188 = vperm.xlu1 %852, %v39_v5   ;;  %853 = vset.pattern.permute.xlu2 %v1016_v1 }
  0x15   :  { %192 = vperm.xlu2 %853, %v40_v3  }
  0x1a   :  { %61 = vperm.xlu0 %848, %v37_v8  }
  0x1c   :  { %854 = vset.pattern.permute.xlu1 %v1017_v2 }
  0x1d   :  { %66 = vperm.xlu1 %854, %v38_v9   ;;  %855 = vset.pattern.permute.xlu2 %v1017_v2 }
  0x1e   :  { %127 = vperm.xlu2 %855, %v44_v10  }
  0x22   :  { %132 = vperm.xlu0 %848, %v45_v11  }
  0x25   :  { %856 = vset.pattern.permute.xlu1 %v1016_v1 }
  0x26   :  { %180 = vperm.xlu1 %856, %v37_v8   ;;  %857 = vset.pattern.permute.xlu2 %v1016_v1 }
  0x27   :  { %184 = vperm.xlu2 %857, %v38_v9  }
  0x2a   :  { %51 = vperm.xlu0 %848, %v35_v12  }
  0x2e   :  { %858 = vset.pattern.permute.xlu1 %v1017_v2 }
  0x2f   :  { %56 = vperm.xlu1 %858, %v36_v13   ;;  %859 = vset.pattern.permute.xlu2 %v1017_v2 }
  0x30   :  { %117 = vperm.xlu2 %859, %v42_v14  }
  0x32   :  { %122 = vperm.xlu0 %848, %v43_v15  }
  0x37   :  { %860 = vset.pattern.permute.xlu1 %v1016_v1 }
  0x38   :  { %172 = vperm.xlu1 %860, %v35_v12   ;;  %861 = vset.pattern.permute.xlu2 %v1016_v1 }
  0x39   :  { %176 = vperm.xlu2 %861, %v36_v13  }
  0x3a   :  { %329 = vperm.xlu0 %848, %v296_v16  }
  0x40   :  { %862 = vset.pattern.permute.xlu1 %v1017_v2 }
  0x41   :  { %863 = vset.pattern.permute.xlu2 %v1017_v2 }
  0x42   :  { %309 = vperm.xlu0 %848, %v292_v17  }
  0x4a   :  { %304 = vperm.xlu0 %848, %v291_v18  }
  0x52   :  { %531 = vperm.xlu0 %848, %v502_v19  }
  0x5a   :  { %506 = vperm.xlu0 %848, %v497_v20  }
  0x5e   :  { %v1126_v21 = vpop.permute.xlu2 %76 }
  0x5f   :  { %v109_v45 = vmul.f32 %v1143_v30, %v1126_v21  ;;  %v110_v46 = vmul.f32 %v1145_v31, %v1126_v21 }
  0x66   :  { %v1133_v23 = vpop.permute.xlu2 %137 }
  0x6f   :  { %v1155_v36 = vpop.permute.xlu2 %192 }
  0x70   :  { %v223_v48 = vmul.f32 %v1147_v32, %v1155_v36  ;;  %v224_v49 = vmul.f32 %v1149_v33, %v1155_v36 }
  0x74   :  { %v1137_v26 = vpop.permute.xlu1 %196  ;;  %v1139_v27 = vpop.permute.xlu0 %81 }
  0x75   :  { %v112_v34 = vmul.f32 %v1143_v30, %v1139_v27  ;;  %v113_v35 = vmul.f32 %v1145_v31, %v1139_v27  ;;  %v226_v38 = vmul.f32 %v1147_v32, %v1137_v26  ;;  %v227_v39 = vmul.f32 %v1149_v33, %v1137_v26 }
  0x78   :  { %v1181_v52 = vpop.permute.xlu2 %127 }
  0x7c   :  { %v1157_v37 = vpop.permute.xlu0 %147 }
  0x7d   :  { %v168_v40 = vadd.f32 %v1157_v37, %v112_v34  ;;  %v169_v41 = vadd.f32 %v1157_v37, %v113_v35  ;;  %v1165_v42 = vpop.permute.xlu1 %71  ;;  %v87_v34 = vperm.slane %v1131_v22, 4 }
  0x7e   :  { %v106_v47 = vmul.f32 %v1143_v30, %v1165_v42  ;;  %v107_v50 = vmul.f32 %v1145_v31, %v1165_v42 }
  0x7f   :  { %v247_v43 = vadd.f32 %v226_v38, %v168_v40  ;;  %v248_v44 = vadd.f32 %v227_v39, %v169_v41 }
  0x80   :  { %v162_v57 = vadd.f32 %v1133_v23, %v106_v47  ;;  %v163_v62 = vadd.f32 %v1133_v23, %v107_v50  ;;  %v1228_v47 = vperm.slane %v87_v34, 0  ;;  %v289_v34 = vld [vmem:[%s1460_s3 + $0x18] sm:$0x1] }
  0x81   :  { %864 = vtanh.f32 %v247_v43  ;;  %v1197_v7 = vpop.permute.xlu2 %184 }
  0x82   :  { %866 = vtanh.f32 %v248_v44  ;;  %v217_v15 = vmul.f32 %v1147_v32, %v1197_v7  ;;  %v218_v18 = vmul.f32 %v1149_v33, %v1197_v7  ;;  %v114_v50 = vmul.f32 %v1228_v47, %v1139_v27 }
  0x84   :  { %v1179_v51 = vpop.permute.xlu0 %142 }
  0x85   :  { %v165_v53 = vadd.f32 %v1179_v51, %v109_v45  ;;  %v166_v54 = vadd.f32 %v1179_v51, %v110_v46 }
  0x86   :  { %v1185_v55 = vpop.permute.xlu1 %188 }
  0x87   :  { %v865_v56 = vpop.eup %864  ;;  %v244_v58 = vadd.f32 %v223_v48, %v165_v53  ;;  %v245_v59 = vadd.f32 %v224_v49, %v166_v54  ;;  %v220_v60 = vmul.f32 %v1147_v32, %v1185_v55  ;;  %v221_v63 = vmul.f32 %v1149_v33, %v1185_v55 }
  0x88   :  { %v867_v61 = vpop.eup %866  ;;  %v280_v0 = vpack.c.bf16 %v865_v56, %v865_v56  ;;  %v201_v48 = vperm.slane %v1131_v22, 5 }
  0x89   :  { %v241_v1 = vadd.f32 %v220_v60, %v162_v57  ;;  %v281_v2 = vpack.c.bf16 %v867_v61, %v867_v61  ;;  %868 = vtanh.f32 %v244_v58  ;;  %v242_v3 = vadd.f32 %v221_v63, %v163_v62 }
  0x8a   :  { %v365_v4 = vsel %vm363_vm0, %v280_v0, 0  ;;  %870 = vtanh.f32 %v245_v59  ;;  %v1220_v39 = vpop.permute.xlu2 %117  ;;  %v1235_v53 = vperm.slane %v201_v48, 1  ;;  %v170_v58 = vadd.f32 %v1157_v37, %v114_v50 }
  0x8b   :  { %377 = vmatpush.bf16.msra.mxu0 %v365_v4  ;;  %837 = vmatpush.bf16.msra.mxu3 %v365_v4  ;;  %v368_v5 = vsel %vm363_vm0, %v281_v2, 0  ;;  %872 = vtanh.f32 %v241_v1 }
  0x8c   :  { %405 = vmatpush.bf16.msra.mxu1 %v368_v5  ;;  %841 = vmatpush.bf16.msra.mxu2 %v368_v5  ;;  %v1195_v6 = vpop.permute.xlu0 %61  ;;  %874 = vtanh.f32 %v242_v3  ;;  %v228_v63 = vmul.f32 %v1235_v53, %v1137_v26  ;;  %v294_v26 = vld [vmem:[%s1461_s4 + $0x20] sm:$0xff] }
  0x8d   :  { %v100_v17 = vmul.f32 %v1143_v30, %v1195_v6  ;;  %v101_v24 = vmul.f32 %v1145_v31, %v1195_v6  ;;  %319 = vperm.xlu1 %862, %v294_v26   ;;  %v498_v26 = vld [vmem:[%s1463_s6 + $0x8] sm:$0xff] }
  0x8e   :  { %v249_v5 = vadd.f32 %v228_v63, %v170_v58  ;;  %v831_v58 = vld [vmem:[%s1460_s3] sm:$0xff] }
  0x8f   :  { %v1199_v8 = vpop.permute.xlu1 %66  ;;  %v869_v9 = vpop.eup %868  ;;  %v156_v40 = vadd.f32 %v1181_v52, %v100_v17  ;;  %v157_v41 = vadd.f32 %v1181_v52, %v101_v24  ;;  %v102_v24 = vmul.f32 %v1228_v47, %v1195_v6  ;;  %v219_v6 = vmul.f32 %v1235_v53, %v1197_v7  ;;  %v290_v63 = vld [vmem:[%s1461_s4] sm:$0xff] }
  0x90   :  { %v871_v10 = vpop.eup %870  ;;  %v103_v13 = vmul.f32 %v1143_v30, %v1199_v8  ;;  %v104_v14 = vmul.f32 %v1145_v31, %v1199_v8 }
  0x91   :  { %v873_v11 = vpop.eup %872 }
  0x92   :  { %v875_v12 = vpop.eup %874  ;;  %v277_v16 = vpack.c.bf16 %v869_v9, %v873_v11  ;;  %v108_v11 = vmul.f32 %v1228_v47, %v1165_v42 }
  0x93   :  { %v278_v20 = vpack.c.bf16 %v871_v10, %v875_v12  ;;  %v1240_v22 = vpop.permute.xlu2 %176 }
  0x94   :  { %v1211_v19 = vpop.permute.xlu0 %132  ;;  %378 = vmatpush.bf16.msra.mxu0 %v277_v16  ;;  %838 = vmatpush.bf16.msra.mxu3 %v277_v16  ;;  %v211_v1 = vmul.f32 %v1147_v32, %v1240_v22  ;;  %v212_v3 = vmul.f32 %v1149_v33, %v1240_v22  ;;  %v164_v42 = vadd.f32 %v1133_v23, %v108_v11  ;;  %v500_v11 = vld [vmem:[%s1463_s6 + $0x18] sm:$0xff] }
  0x95   :  { %v159_v25 = vadd.f32 %v1211_v19, %v103_v13  ;;  %v160_v28 = vadd.f32 %v1211_v19, %v104_v14  ;;  %406 = vmatpush.bf16.msra.mxu1 %v278_v20  ;;  %842 = vmatpush.bf16.msra.mxu2 %v278_v20  ;;  %v111_v13 = vmul.f32 %v1228_v47, %v1126_v21 }
  0x96   :  { %v222_v14 = vmul.f32 %v1235_v53, %v1185_v55  ;;  %v225_v21 = vmul.f32 %v1235_v53, %v1155_v36  ;;  %v295_v55 = vld [vmem:[%s1461_s4 + $0x28] sm:$0xff] }
  0x97   :  { %v238_v29 = vadd.f32 %v217_v15, %v159_v25  ;;  %v239_v35 = vadd.f32 %v218_v18, %v160_v28  ;;  %v167_v20 = vadd.f32 %v1179_v51, %v111_v13  ;;  %324 = vperm.xlu2 %863, %v295_v55  }
  0x98   :  { %v1218_v38 = vpop.permute.xlu1 %180  ;;  %v243_v23 = vadd.f32 %v222_v14, %v164_v42 }
  0x99   :  { %v214_v43 = vmul.f32 %v1147_v32, %v1218_v38  ;;  %v215_v44 = vmul.f32 %v1149_v33, %v1218_v38  ;;  %876 = vtanh.f32 %v238_v29  ;;  %v216_v36 = vmul.f32 %v1235_v53, %v1218_v38 }
  0x9a   :  { %878 = vtanh.f32 %v239_v35  ;;  %v246_v29 = vadd.f32 %v225_v21, %v167_v20  ;;  %v158_v35 = vadd.f32 %v1181_v52, %v102_v24 }
  0x9b   :  { %v235_v45 = vadd.f32 %v214_v43, %v156_v40  ;;  %v236_v46 = vadd.f32 %v215_v44, %v157_v41  ;;  %v345_v44 = vunpack.c.l.b16 %v289_v34 }
  0x9c   :  { %v1231_v49 = vpop.permute.xlu0 %51  ;;  %v237_v43 = vadd.f32 %v216_v36, %v158_v35 }
  0x9d   :  { %880 = vtanh.f32 %v235_v45  ;;  %v94_v9 = vmul.f32 %v1143_v30, %v1231_v49  ;;  %v95_v10 = vmul.f32 %v1145_v31, %v1231_v49 }
  0x9e   :  { %882 = vtanh.f32 %v236_v46 }
  0x9f   :  { %v877_v54 = vpop.eup %876  ;;  %884 = vtanh.f32 %v249_v5  ;;  %299 = vperm.xlu2 %863, %v290_v63   ;;  %v832_v5 = vld [vmem:[%s1460_s3 + $0x8] sm:$0xff] }
  0xa0   :  { %v879_v57 = vpop.eup %878 }
  0xa1   :  { %v57_v56 = vpop.permute.xlu1 %56 }
  0xa2   :  { %v97_v59 = vmul.f32 %v1143_v30, %v57_v56  ;;  %v98_v60 = vmul.f32 %v1145_v31, %v57_v56  ;;  %v150_v30 = vadd.f32 %v1220_v39, %v94_v9  ;;  %v151_v31 = vadd.f32 %v1220_v39, %v95_v10  ;;  %v501_v9 = vld [vmem:[%s1463_s6 + $0x20] sm:$0xff]  ;;  %v833_v10 = vld [vmem:[%s1460_s3 + $0x10] sm:$0xff] }
  0xa3   :  { %v881_v61 = vpop.eup %880  ;;  %v99_v38 = vmul.f32 %v1228_v47, %v57_v56 }
  0xa4   :  { %v883_v62 = vpop.eup %882  ;;  %v1244_v27 = vpop.permute.xlu0 %122  ;;  %v274_v0 = vpack.c.bf16 %v877_v54, %v881_v61 }
  0xa5   :  { %v153_v2 = vadd.f32 %v1244_v27, %v97_v59  ;;  %v275_v37 = vpack.c.bf16 %v879_v57, %v883_v62  ;;  %v154_v4 = vadd.f32 %v1244_v27, %v98_v60  ;;  %v885_v51 = vpop.eup %884  ;;  %v349_v59 = vpack.c.b16 %v345_v44, %v345_v44  ;;  %v503_v60 = vld [vmem:[%s1463_s6 + $0x30] sm:$0x3] }
  0xa6   :  { %379 = vmatpush.bf16.msra.mxu0 %v274_v0  ;;  %839 = vmatpush.bf16.msra.mxu3 %v274_v0  ;;  %v282_v46 = vpack.c.bf16 %v885_v51, %v885_v51 }
  0xa7   :  { %407 = vmatpush.bf16.msra.mxu1 %v275_v37  ;;  %843 = vmatpush.bf16.msra.mxu2 %v275_v37  ;;  %v232_v12 = vadd.f32 %v211_v1, %v153_v2  ;;  %v233_v15 = vadd.f32 %v212_v3, %v154_v4  ;;  %v499_v1 = vld [vmem:[%s1463_s6 + $0x10] sm:$0xff] }
  0xa8   :  { %526 = vperm.xlu2 %863, %v501_v9  }
  0xa9   :  { %886 = vtanh.f32 %v232_v12  ;;  %v696_v12 = vld [vmem:[%s1465_s8] sm:$0x3] }
  0xaa   :  { %v173_v16 = vpop.permute.xlu1 %172  ;;  %888 = vtanh.f32 %v233_v15 }
  0xab   :  { %v208_v17 = vmul.f32 %v1147_v32, %v173_v16  ;;  %v209_v18 = vmul.f32 %v1149_v33, %v173_v16  ;;  %v293_v32 = vld [vmem:[%s1461_s4 + $0x18] sm:$0xff]  ;;  %v105_v33 = vmul.f32 %v1228_v47, %v1199_v8  ;;  %v96_v8 = vmul.f32 %v1228_v47, %v1231_v49 }
  0xac   :  { %314 = vperm.xlu1 %862, %v293_v32   ;;  %v210_v7 = vmul.f32 %v1235_v53, %v173_v16  ;;  %v155_v49 = vadd.f32 %v1244_v27, %v99_v38  ;;  %v1343_v15 = vpop.permute.xlu0 %329 }
  0xad   :  { %v229_v25 = vadd.f32 %v208_v17, %v150_v30  ;;  %v230_v28 = vadd.f32 %v209_v18, %v151_v31  ;;  %v161_v40 = vadd.f32 %v1211_v19, %v105_v33  ;;  %v152_v52 = vadd.f32 %v1220_v39, %v96_v8 }
  0xae   :  { %v213_v19 = vmul.f32 %v1235_v53, %v1240_v22  ;;  %v371_v22 = vsel %vm363_vm0, %v282_v46, 0 }
  0xaf   :  { %890 = vtanh.f32 %v229_v25  ;;  %v887_v41 = vpop.eup %886  ;;  %v240_v50 = vadd.f32 %v219_v6, %v161_v40  ;;  %v231_v56 = vadd.f32 %v210_v7, %v152_v52 }
  0xb0   :  { %892 = vtanh.f32 %v230_v28  ;;  %v889_v45 = vpop.eup %888  ;;  %v234_v53 = vadd.f32 %v213_v19, %v155_v49  ;;  %521 = vperm.xlu2 %863, %v500_v11  }
  0xb1   :  { %894 = vtanh.f32 %v243_v23 }
  0xb2   :  { %896 = vtanh.f32 %v246_v29 }
  0xb3   :  { %898 = vtanh.f32 %v237_v43 }
  0xb4   :  { %900 = vtanh.f32 %v240_v50  ;;  %536 = vperm.xlu1 %862, %v503_v60   ;;  %v1359_v43 = vpop.permute.xlu0 %309 }
  0xb5   :  { %v891_v48 = vpop.eup %890  ;;  %902 = vtanh.f32 %v231_v56 }
  0xb6   :  { %v893_v54 = vpop.eup %892  ;;  %v271_v47 = vpack.c.bf16 %v887_v41, %v891_v48  ;;  %904 = vtanh.f32 %v234_v53 }
  0xb7   :  { %v272_v57 = vpack.c.bf16 %v889_v45, %v893_v54  ;;  %v895_v39 = vpop.eup %894 }
  0xb8   :  { %380 = vmatpush.bf16.msra.mxu0 %v271_v47  ;;  %840 = vmatpush.bf16.msra.mxu3 %v271_v47  ;;  %v897_v61 = vpop.eup %896 }
  0xb9   :  { %408 = vmatpush.bf16.msra.mxu1 %v272_v57  ;;  %844 = vmatpush.bf16.msra.mxu2 %v272_v57  ;;  %v279_v62 = vpack.c.bf16 %v897_v61, %v895_v39  ;;  %v899_v27 = vpop.eup %898 }
  0xba   :  { %v901_v0 = vpop.eup %900  ;;  %699 = vperm.xlu2 %863, %v696_v12  }
  0xbb   :  { %792 = vmatmul.msk.bf16.vlgmr.msra.gmra.mxu0 %vm350_vm1, %v831_v58  ;;  %795 = vmatmul.msk.bf16.vlgmr.msra.gmra.mxu3 %vm350_vm1, %v349_v59  ;;  %v276_v2 = vpack.c.bf16 %v901_v0, %v899_v27  ;;  %v903_v37 = vpop.eup %902 }
  0xbc   :  { %796 = vmatmul.msk.bf16.vlgmr.msra.gmra.mxu1 %vm350_vm1, %v831_v58  ;;  %799 = vmatmul.msk.bf16.vlgmr.msra.gmra.mxu2 %vm350_vm1, %v349_v59  ;;  %v905_v3 = vpop.eup %904 }
  0xbd   :  { %433 = vmatpush.bf16.msrb.mxu2 %v371_v22  ;;  %516 = vperm.xlu1 %862, %v499_v1   ;;  %v273_v4 = vpack.c.bf16 %v905_v3, %v903_v37 }
  0xc1   :  { %434 = vmatpush.bf16.msrb.mxu2 %v279_v62 }
  0xc5   :  { %435 = vmatpush.bf16.msrb.mxu2 %v276_v2  ;;  %511 = vperm.xlu1 %862, %v498_v26  }
  0xc9   :  { %436 = vmatpush.bf16.msrb.mxu2 %v273_v4 }
  0xcb   :  { %793 = vmatmul.msk.bf16.gmra.mxu0 %vm350_vm1, %v832_v5 }
  0xcc   :  { %797 = vmatmul.msk.bf16.gmra.mxu1 %vm350_vm1, %v832_v5  ;;  %800 = vmatmul.msk.bf16.vlgmr.msrb.gmra.mxu2 %vm350_vm1, %v831_v58  ;;  %v305_v58 = vpop.permute.xlu0 %304 }
  0xdb   :  { %794 = vmatmul.msk.bf16.gmra.mxu0 %vm350_vm1, %v833_v10 }
  0xdc   :  { %798 = vmatmul.msk.bf16.gmra.mxu1 %vm350_vm1, %v833_v10  ;;  %801 = vmatmul.msk.bf16.gmra.mxu2 %vm350_vm1, %v832_v5 }
  0xec   :  { %802 = vmatmul.msk.bf16.gmra.mxu2 %vm350_vm1, %v833_v10 }
  0xf1   :  { %v1349_v51 = vpop.permute.xlu2 %324 }
  0xf9   :  { %v1357_v8 = vpop.permute.xlu2 %299 }
  0xfc   :  { %803 = vmatmul.msk.bf16.gmra.mxu2 %vm350_vm1, %v349_v59 }
  0xff   :  { %v1353_v35 = vpop.permute.xlu1 %319 }
 0x11e   :  { %v315_v46 = vpop.permute.xlu1 %314 }
 0x138   :  { %v382_v13 = vpop.f32.mrf.mxu0 }
 0x139   :  { %v410_v14 = vpop.f32.mrf.mxu1  ;;  %v383_v7 = vadd.f32 %v382_v13, %v1357_v8 }
 0x13a   :  { %v411_v44 = vadd.f32 %v410_v14, %v1357_v8 }
 0x13e   :  { %v397_v16 = vpop.f32.mrf.mxu3 }
 0x13f   :  { %v398_v30 = vadd.f32 %v397_v16, %v1343_v15  ;;  %v425_v31 = vpop.f32.mrf.mxu2  ;;  %v834_v16 = vld [vmem:[%s1462_s5] sm:$0xff] }
 0x140   :  { %v426_v17 = vadd.f32 %v425_v31, %v1343_v15  ;;  %v384_v18 = vpop.f32.mrf.mxu0 }
 0x141   :  { %906 = vtanh.f32 %v398_v30  ;;  %v412_v42 = vpop.f32.mrf.mxu1  ;;  %v385_v39 = vadd.f32 %v384_v18, %v305_v58 }
 0x142   :  { %908 = vtanh.f32 %v426_v17  ;;  %v413_v22 = vadd.f32 %v412_v42, %v305_v58 }
 0x143   :  { %910 = vtanh.f32 %v383_v7 }
 0x144   :  { %912 = vtanh.f32 %v411_v44 }
 0x146   :  { %v399_v20 = vpop.f32.mrf.mxu3 }
 0x147   :  { %v907_v21 = vpop.eup %906  ;;  %v427_v55 = vpop.f32.mrf.mxu2  ;;  %v835_v20 = vld [vmem:[%s1462_s5 + $0x8] sm:$0xff] }
 0x148   :  { %v909_v24 = vpop.eup %908  ;;  %v387_v25 = vpop.f32.mrf.mxu0  ;;  %v487_v28 = vpack.c.bf16 %v907_v21, %v907_v21 }
 0x149   :  { %v415_v32 = vpop.f32.mrf.mxu1  ;;  %v488_v23 = vpack.c.bf16 %v909_v24, %v909_v24  ;;  %v388_v57 = vadd.f32 %v387_v25, %v1359_v43  ;;  %v911_v60 = vpop.eup %910 }
 0x14a   :  { %v570_v33 = vsel %vm363_vm0, %v487_v28, 0  ;;  %v416_v59 = vadd.f32 %v415_v32, %v1359_v43  ;;  %v913_v53 = vpop.eup %912 }
 0x14b   :  { %582 = vmatpush.bf16.msrb.mxu3 %v570_v33  ;;  %v573_v36 = vsel %vm363_vm0, %v488_v23, 0 }
 0x14c   :  { %610 = vmatpush.bf16.msrb.mxu0 %v573_v36 }
 0x14f   :  { %v1351_v29 = vpop.f32.mrf.mxu2 }
 0x150   :  { %v389_v6 = vpop.f32.mrf.mxu0  ;;  %v439_v23 = vadd.f32 %v1351_v29, %v1357_v8  ;;  %v496_v8 = vld [vmem:[%s1462_s5 + $0x18] sm:$0x1] }
 0x151   :  { %v417_v34 = vpop.f32.mrf.mxu1  ;;  %v390_v19 = vadd.f32 %v389_v6, %v315_v46 }
 0x152   :  { %v418_v47 = vadd.f32 %v417_v34, %v315_v46 }
 0x157   :  { %v1355_v40 = vpop.f32.mrf.mxu2 }
 0x158   :  { %v392_v38 = vpop.f32.mrf.mxu0 }
 0x159   :  { %v420_v41 = vpop.f32.mrf.mxu1  ;;  %v393_v45 = vadd.f32 %v392_v38, %v1353_v35 }
 0x15a   :  { %v421_v48 = vadd.f32 %v420_v41, %v1353_v35 }
 0x15b   :  { %914 = vtanh.f32 %v393_v45 }
 0x15c   :  { %916 = vtanh.f32 %v421_v48 }
 0x15f   :  { %v443_v50 = vpop.f32.mrf.mxu2 }
 0x160   :  { %v394_v52 = vpop.f32.mrf.mxu0  ;;  %v444_v55 = vadd.f32 %v443_v50, %v1359_v43  ;;  %v552_v43 = vunpack.c.l.b16 %v496_v8 }
 0x161   :  { %v395_v49 = vadd.f32 %v394_v52, %v1349_v51  ;;  %v422_v54 = vpop.f32.mrf.mxu1  ;;  %v915_v61 = vpop.eup %914 }
 0x162   :  { %v423_v56 = vadd.f32 %v422_v54, %v1349_v51  ;;  %v917_v63 = vpop.eup %916  ;;  %v556_v7 = vpack.c.b16 %v552_v43, %v552_v43 }
 0x163   :  { %918 = vtanh.f32 %v395_v49 }
 0x164   :  { %920 = vtanh.f32 %v423_v56  ;;  %v1403_v56 = vpop.permute.xlu1 %536 }
 0x165   :  { %922 = vtanh.f32 %v390_v19 }
 0x166   :  { %924 = vtanh.f32 %v418_v47 }
 0x167   :  { %926 = vtanh.f32 %v388_v57  ;;  %v445_v62 = vpop.f32.mrf.mxu2 }
 0x168   :  { %928 = vtanh.f32 %v416_v59  ;;  %v446_v21 = vadd.f32 %v445_v62, %v315_v46  ;;  %v1405_v59 = vpop.permute.xlu2 %526 }
 0x169   :  { %v919_v27 = vpop.eup %918  ;;  %930 = vtanh.f32 %v385_v39 }
 0x16a   :  { %v921_v0 = vpop.eup %920  ;;  %932 = vtanh.f32 %v413_v22  ;;  %v484_v1 = vpack.c.bf16 %v919_v27, %v915_v61  ;;  %v1411_v61 = vpop.permute.xlu0 %531 }
 0x16b   :  { %v923_v2 = vpop.eup %922  ;;  %v485_v37 = vpack.c.bf16 %v921_v0, %v917_v63 }
 0x16c   :  { %v925_v3 = vpop.eup %924  ;;  %583 = vmatpush.bf16.msrb.mxu3 %v484_v1 }
 0x16d   :  { %v927_v4 = vpop.eup %926  ;;  %611 = vmatpush.bf16.msrb.mxu0 %v485_v37 }
 0x16e   :  { %v929_v5 = vpop.eup %928  ;;  %v481_v26 = vpack.c.bf16 %v923_v2, %v927_v4 }
 0x16f   :  { %v931_v9 = vpop.eup %930  ;;  %v448_v10 = vpop.f32.mrf.mxu2  ;;  %v482_v11 = vpack.c.bf16 %v925_v3, %v929_v5 }
 0x170   :  { %v933_v12 = vpop.eup %932  ;;  %584 = vmatpush.bf16.msrb.mxu3 %v481_v26  ;;  %v478_v13 = vpack.c.bf16 %v931_v9, %v911_v60  ;;  %v449_v42 = vadd.f32 %v448_v10, %v1353_v35  ;;  %v1418_v1 = vpop.permute.xlu2 %521 }
 0x171   :  { %612 = vmatpush.bf16.msrb.mxu0 %v482_v11  ;;  %v479_v14 = vpack.c.bf16 %v933_v12, %v913_v53  ;;  %v1409_v53 = vpop.permute.xlu1 %516 }
 0x174   :  { %585 = vmatpush.bf16.msrb.mxu3 %v478_v13 }
 0x175   :  { %613 = vmatpush.bf16.msrb.mxu0 %v479_v14  ;;  %v1428_v14 = vpop.permute.xlu0 %506 }
 0x177   :  { %v450_v30 = vpop.f32.mrf.mxu2  ;;  %816 = vmatmul.msk.bf16.vlgmr.msrb.gmra.mxu3 %vm350_vm1, %v834_v16 }
 0x178   :  { %820 = vmatmul.msk.bf16.vlgmr.msrb.gmra.mxu0 %vm350_vm1, %v834_v16  ;;  %v451_v18 = vadd.f32 %v450_v30, %v1349_v51 }
 0x179   :  { %v1424_v10 = vpop.permute.xlu1 %511 }
 0x17f   :  { %v453_v31 = vpop.f32.mrf.mxu2 }
 0x180   :  { %v454_v17 = vadd.f32 %v453_v31, %v1343_v15  ;;  %v441_v15 = vadd.f32 %v1355_v40, %v305_v58  ;;  %v836_v40 = vld [vmem:[%s1462_s5 + $0x10] sm:$0xff] }
 0x182   :  { %934 = vtanh.f32 %v454_v17 }
 0x183   :  { %936 = vtanh.f32 %v451_v18 }
 0x184   :  { %938 = vtanh.f32 %v449_v42 }
 0x185   :  { %940 = vtanh.f32 %v446_v21 }
 0x186   :  { %942 = vtanh.f32 %v444_v55 }
 0x187   :  { %v455_v24 = vpop.f32.mrf.mxu2  ;;  %817 = vmatmul.msk.bf16.gmra.mxu3 %vm350_vm1, %v835_v20  ;;  %944 = vtanh.f32 %v441_v15 }
 0x188   :  { %v935_v25 = vpop.eup %934  ;;  %821 = vmatmul.msk.bf16.gmra.mxu0 %vm350_vm1, %v835_v20  ;;  %946 = vtanh.f32 %v439_v23 }
 0x189   :  { %v489_v28 = vpack.c.bf16 %v935_v25, %v935_v25  ;;  %v937_v32 = vpop.eup %936 }
 0x18a   :  { %v939_v36 = vpop.eup %938 }
 0x18b   :  { %v576_v33 = vsel %vm363_vm0, %v489_v28, 0  ;;  %v486_v51 = vpack.c.bf16 %v937_v32, %v939_v36  ;;  %v941_v6 = vpop.eup %940 }
 0x18c   :  { %638 = vmatpush.bf16.msrb.mxu1 %v576_v33  ;;  %v943_v34 = vpop.eup %942 }
 0x18d   :  { %v483_v35 = vpack.c.bf16 %v941_v6, %v943_v34  ;;  %v945_v38 = vpop.eup %944 }
 0x18e   :  { %v947_v41 = vpop.eup %946 }
 0x18f   :  { %v480_v29 = vpack.c.bf16 %v945_v38, %v947_v41 }
 0x190   :  { %639 = vmatpush.bf16.msrb.mxu1 %v486_v51 }
 0x194   :  { %640 = vmatpush.bf16.msrb.mxu1 %v483_v35 }
 0x197   :  { %818 = vmatmul.msk.bf16.gmra.mxu3 %vm350_vm1, %v836_v40 }
 0x198   :  { %822 = vmatmul.msk.bf16.gmra.mxu0 %vm350_vm1, %v836_v40  ;;  %641 = vmatpush.bf16.msrb.mxu1 %v480_v29 }
 0x19b   :  { %824 = vmatmul.msk.bf16.vlgmr.msrb.gmra.mxu1 %vm350_vm1, %v834_v16 }
 0x1a7   :  { %819 = vmatmul.msk.bf16.gmra.mxu3 %vm350_vm1, %v556_v7 }
 0x1a8   :  { %823 = vmatmul.msk.bf16.gmra.mxu0 %vm350_vm1, %v556_v7 }
 0x1ab   :  { %825 = vmatmul.msk.bf16.gmra.mxu1 %vm350_vm1, %v835_v20 }
 0x1bb   :  { %826 = vmatmul.msk.bf16.gmra.mxu1 %vm350_vm1, %v836_v40 }
 0x1cb   :  { %827 = vmatmul.msk.bf16.gmra.mxu1 %vm350_vm1, %v556_v7 }
 0x1f5   :  { %v615_v44 = vpop.f32.mrf.mxu0 }
 0x1f6   :  { %v616_v17 = vadd.f32 %v615_v44, %v1428_v14  ;;  %v695_v44 = vld [vmem:[%s1464_s7] sm:$0x1]  ;;  %s1018_s7 = smov [#allocation2]  }
 0x1f7   :  { %s769_s13 = sshll.u32 %s1018_s7, 4  ;;  %s770_s13 = int_to_ptr.vmem [resolvable:$true] %s769_s13 }
 0x1fa   :  { %v587_v45 = vpop.f32.mrf.mxu3 }
 0x1fb   :  { %v588_v23 = vadd.f32 %v587_v45, %v1428_v14 }
 0x1fd   :  { %v617_v46 = vpop.f32.mrf.mxu0 }
 0x1fe   :  { %v618_v12 = vadd.f32 %v617_v46, %v1424_v10 }
 0x202   :  { %v589_v48 = vpop.f32.mrf.mxu3 }
 0x203   :  { %v590_v24 = vadd.f32 %v589_v48, %v1424_v10 }
 0x205   :  { %v620_v50 = vpop.f32.mrf.mxu0 }
 0x206   :  { %v621_v5 = vadd.f32 %v620_v50, %v1409_v53 }
 0x20a   :  { %v592_v52 = vpop.f32.mrf.mxu3 }
 0x20b   :  { %v593_v20 = vadd.f32 %v592_v52, %v1409_v53 }
 0x20d   :  { %v622_v19 = vpop.f32.mrf.mxu0 }
 0x20e   :  { %v623_v37 = vadd.f32 %v622_v19, %v1418_v1 }
 0x212   :  { %v594_v49 = vpop.f32.mrf.mxu3 }
 0x213   :  { %v595_v16 = vadd.f32 %v594_v49, %v1418_v1 }
 0x215   :  { %v625_v54 = vpop.f32.mrf.mxu0 }
 0x216   :  { %v626_v27 = vadd.f32 %v625_v54, %v1405_v59 }
 0x218   :  { %v1401_v47 = vpop.f32.mrf.mxu1 }
 0x21a   :  { %v597_v57 = vpop.f32.mrf.mxu3 }
 0x21b   :  { %v598_v11 = vadd.f32 %v597_v57, %v1405_v59 }
 0x21d   :  { %v627_v58 = vpop.f32.mrf.mxu0 }
 0x21e   :  { %v628_v63 = vadd.f32 %v627_v58, %v1411_v61 }
 0x220   :  { %v1407_v60 = vpop.f32.mrf.mxu1 }
 0x222   :  { %v599_v39 = vpop.f32.mrf.mxu3 }
 0x223   :  { %v600_v4 = vadd.f32 %v599_v39, %v1411_v61 }
 0x225   :  { %v630_v22 = vpop.f32.mrf.mxu0 }
 0x226   :  { %v631_v62 = vadd.f32 %v630_v22, %v1403_v56  ;;  %v646_v22 = vadd.f32 %v1407_v60, %v1424_v10 }
 0x228   :  { %948 = vtanh.f32 %v631_v62  ;;  %v1416_v0 = vpop.f32.mrf.mxu1 }
 0x229   :  { %950 = vtanh.f32 %v628_v63  ;;  %v649_v57 = vadd.f32 %v1416_v0, %v1409_v53 }
 0x22a   :  { %v602_v2 = vpop.f32.mrf.mxu3  ;;  %952 = vtanh.f32 %v626_v27 }
 0x22b   :  { %v603_v3 = vadd.f32 %v602_v2, %v1403_v56 }
 0x22d   :  { %954 = vtanh.f32 %v603_v3  ;;  %v632_v26 = vpop.f32.mrf.mxu0 }
 0x22e   :  { %v949_v9 = vpop.eup %948  ;;  %956 = vtanh.f32 %v623_v37  ;;  %v700_v26 = vpop.permute.xlu2 %699 }
 0x22f   :  { %v693_v13 = vpack.c.bf16 %v949_v9, %v949_v9  ;;  %958 = vtanh.f32 %v600_v4  ;;  %v951_v31 = vpop.eup %950 }
 0x230   :  { %v650_v30 = vpop.f32.mrf.mxu1  ;;  %960 = vtanh.f32 %v621_v5  ;;  %v953_v42 = vpop.eup %952 }
 0x231   :  { %v709_v18 = vsel %vm363_vm0, %v693_v13, 0  ;;  %962 = vtanh.f32 %v598_v11  ;;  %v690_v15 = vpack.c.bf16 %v951_v31, %v953_v42  ;;  %v651_v54 = vadd.f32 %v650_v30, %v1418_v1 }
 0x232   :  { %731 = vmatpush.bf16.msra.mxu3 %v709_v18  ;;  %v604_v21 = vpop.f32.mrf.mxu3  ;;  %964 = vtanh.f32 %v618_v12 }
 0x233   :  { %v955_v55 = vpop.eup %954  ;;  %966 = vtanh.f32 %v595_v16 }
 0x234   :  { %v692_v25 = vpack.c.bf16 %v955_v55, %v955_v55  ;;  %v957_v28 = vpop.eup %956  ;;  %968 = vtanh.f32 %v616_v17 }
 0x235   :  { %v959_v32 = vpop.eup %958  ;;  %970 = vtanh.f32 %v593_v20 }
 0x236   :  { %732 = vmatpush.bf16.msra.mxu3 %v690_v15  ;;  %v706_v33 = vsel %vm363_vm0, %v692_v25, 0  ;;  %v961_v36 = vpop.eup %960  ;;  %972 = vtanh.f32 %v590_v24 }
 0x237   :  { %718 = vmatpush.bf16.msra.mxu2 %v706_v33  ;;  %v963_v51 = vpop.eup %962  ;;  %v687_v34 = vpack.c.bf16 %v957_v28, %v961_v36  ;;  %974 = vtanh.f32 %v588_v23 }
 0x238   :  { %v653_v6 = vpop.f32.mrf.mxu1  ;;  %v965_v35 = vpop.eup %964  ;;  %v689_v38 = vpack.c.bf16 %v959_v32, %v963_v51 }
 0x239   :  { %v967_v40 = vpop.eup %966  ;;  %v654_v49 = vadd.f32 %v653_v6, %v1405_v59 }
 0x23a   :  { %733 = vmatpush.bf16.msra.mxu3 %v687_v34  ;;  %v969_v41 = vpop.eup %968 }
 0x23b   :  { %719 = vmatpush.bf16.msra.mxu2 %v689_v38  ;;  %v971_v29 = vpop.eup %970  ;;  %v684_v8 = vpack.c.bf16 %v965_v35, %v969_v41 }
 0x23c   :  { %v686_v43 = vpack.c.bf16 %v967_v40, %v971_v29  ;;  %v973_v7 = vpop.eup %972 }
 0x23d   :  { %v975_v45 = vpop.eup %974 }
 0x23e   :  { %734 = vmatpush.bf16.msra.mxu3 %v684_v8  ;;  %v683_v48 = vpack.c.bf16 %v973_v7, %v975_v45 }
 0x23f   :  { %720 = vmatpush.bf16.msra.mxu2 %v686_v43 }
 0x240   :  { %v655_v46 = vpop.f32.mrf.mxu1 }
 0x241   :  { %829 = vmatmul.msk.bf16.vlgmr.msra.gmra.mxu3 %vm350_vm1, %v695_v44  ;;  %v656_v19 = vadd.f32 %v655_v46, %v1411_v61  ;;  %v644_v61 = vadd.f32 %v1401_v47, %v1428_v14 }
 0x243   :  { %721 = vmatpush.bf16.msra.mxu2 %v683_v48 }
 0x246   :  { %828 = vmatmul.msk.bf16.vlgmr.msra.gmra.mxu2 %vm350_vm1, %v695_v44 }
 0x248   :  { %v658_v50 = vpop.f32.mrf.mxu1 }
 0x249   :  { %v659_v52 = vadd.f32 %v658_v50, %v1403_v56 }
 0x24b   :  { %976 = vtanh.f32 %v659_v52 }
 0x24c   :  { %978 = vtanh.f32 %v656_v19 }
 0x24d   :  { %980 = vtanh.f32 %v654_v49 }
 0x24e   :  { %982 = vtanh.f32 %v651_v54 }
 0x24f   :  { %984 = vtanh.f32 %v649_v57 }
 0x250   :  { %v660_v58 = vpop.f32.mrf.mxu1  ;;  %986 = vtanh.f32 %v646_v22 }
 0x251   :  { %v977_v39 = vpop.eup %976  ;;  %988 = vtanh.f32 %v644_v61 }
 0x252   :  { %v694_v62 = vpack.c.bf16 %v977_v39, %v977_v39  ;;  %v979_v56 = vpop.eup %978 }
 0x253   :  { %v981_v63 = vpop.eup %980 }
 0x254   :  { %v712_v59 = vsel %vm363_vm0, %v694_v62, 0  ;;  %v691_v27 = vpack.c.bf16 %v979_v56, %v981_v63  ;;  %v983_v53 = vpop.eup %982 }
 0x255   :  { %744 = vmatpush.bf16.msrb.mxu2 %v712_v59  ;;  %v985_v0 = vpop.eup %984 }
 0x256   :  { %v688_v1 = vpack.c.bf16 %v983_v53, %v985_v0  ;;  %v987_v2 = vpop.eup %986 }
 0x257   :  { %v989_v60 = vpop.eup %988 }
 0x258   :  { %v685_v37 = vpack.c.bf16 %v987_v2, %v989_v60 }
 0x259   :  { %745 = vmatpush.bf16.msrb.mxu2 %v691_v27 }
 0x25d   :  { %746 = vmatpush.bf16.msrb.mxu2 %v688_v1 }
 0x261   :  { %747 = vmatpush.bf16.msrb.mxu2 %v685_v37 }
 0x264   :  { %830 = vmatmul.msk.bf16.vlgmr.msrb.gmra.mxu2 %vm350_vm1, %v695_v44 }
 0x2c4   :  { %v736_v47 = vpop.f32.mrf.mxu3 }
 0x2c5   :  { %v737_v9 = vadd.f32 %v736_v47, %v700_v26 }
 0x2c7   :  { %v756_v13 = vrot.slane %v737_v9, 6 }
 0x2c9   :  { %v723_v3 = vpop.f32.mrf.mxu2 }
 0x2ca   :  { %v724_v10 = vadd.f32 %v723_v3, %v700_v26 }
 0x2cc   :  { %v738_v4 = vpop.f32.mrf.mxu3  ;;  %v759_v16 = vsel %vm758_vm2, %v724_v10, %v756_v13 }
 0x2d1   :  { %v725_v5 = vpop.f32.mrf.mxu2 }
 0x2e7   :  { %v749_v11 = vpop.f32.mrf.mxu2 }
 0x2e8   :  { %v750_v12 = vadd.f32 %v749_v11, %v700_v26 }
 0x2ea   :  { %v757_v14 = vrot.slane %v750_v12, 4 }
 0x2ec   :  { %v761_v30 = vsel %vm760_vm3, %v759_v16, %v757_v14 }
 0x2ed   :  { %763 = vst [vmem:[#allocation2] sm:$0x3f] %v761_v30 }
 0x2ee   :  { %774 = dma.vmem_to_hbm [thread:$0]  %s770_s13, 96, %s772_s16, [#allocation3]  }
 0x2ef   :  { %v751_v31 = vpop.f32.mrf.mxu2 }
 0x2f0   :  { %1014 = dma.done.wait [#allocation3], 96  }
 0x2f1   :  { %1015 = vsyncadd [#allocation3], 4294967200 }
 0x2f2   :  { %779 = vsyncpa [#allocation3], 1 }

</bundles_post_ra>
